<compile_context>
chip_gen: v6e
topology: v6e:2x2x1
jax: 0.10.0
libtpu: 0.0.40
codegen_flags: <defaults>
</compile_context>

<pallas_src>
import functools
import math

import numpy as np
import jax
import jax.numpy as jnp
from jax.experimental import pallas as pl
from jax.experimental.pallas import tpu as pltpu


def _embed_kernel(x_ref, w_ref, sel_ref, role_ref, o_ref, *, compute_dtype):
    """One (TM, TN) output tile:  o = x @ W + sel @ (role + bias)."""
    x = x_ref[...]
    if compute_dtype is not None and x.dtype != jnp.dtype(compute_dtype):
        x = x.astype(compute_dtype)   # in-kernel cast (VPU slack), not a host pass
    y = jnp.dot(x, w_ref[...], preferred_element_type=jnp.float32)
    # Broadcast the per-position role embedding over the TB batch repeats via a
    # one-hot selection matmul (MXU is essentially idle in this mem-bound loop);
    # stays f32 so the role/bias add is full precision on every generation.
    y = y + jnp.dot(sel_ref[...], role_ref[...], preferred_element_type=jnp.float32)
    o_ref[...] = y.astype(o_ref.dtype)


def _vmem_budget_bytes():
    cap = 64 * 1024 * 1024                       # conservative default (v7x-class)
    try:
        cap = int(pltpu.get_tpu_info().vmem_capacity_bytes)
    except Exception:
        pass
    # Leave headroom for compiler scratch / semaphores: ~51 MiB on v7x (64 MiB
    # physical), ~102 MiB on v5e/v6e (128 MiB physical).
    return max(8 * 1024 * 1024, int(cap * 0.8))


def alloy_transformer_forward(x, w_fe, b_fe, role_emb, *,
                              target_rows=None, compute_dtype=None,
                              out_dtype=None, return_padded=False):
    """Executed AlloyTransformer.forward (eval path).

    x:        (B, S, F)   input features
    w_fe:     (F, D)      feature_embeddings weight (transposed torch layout)
    b_fe:     (D,)        feature_embeddings bias
    role_emb: (1, S, D)   role embeddings (S == num_positions == seq_len)

    Returns (B, S, D) in out_dtype (default x.dtype), or the padded
    (B_pad, S, D_pad) slab if return_padded=True.  compute_dtype
    (e.g. jnp.bfloat16) casts x (in-kernel) and the weight for the MXU;
    accumulation and the role/bias add stay f32.
    TODO(synk): on v5e (lowest HBM BW) prefer compute_dtype=jnp.bfloat16.
    """
    B, S, F = x.shape
    Fw, D = w_fe.shape
    assert Fw == F, "weight must be (feature_dim, d_model)"
    assert role_emb.shape == (1, S, D), (
        "role_embeddings must be (1, seq_len, d_model); the reference "
        "broadcast-add requires seq_len == num_positions")
    out_dtype = jnp.dtype(out_dtype) if out_dtype is not None else jnp.dtype(x.dtype)

    # ---- tiling --------------------------------------------------------------
    budget = _vmem_budget_bytes()
    if target_rows is None:
        target_rows = 1024 if budget >= (80 << 20) else 512

    d_pad = pl.cdiv(D, 128) * 128
    # N tile: keep the full d_model resident unless it is large, then split
    # into lane-aligned column tiles (second "parallel" grid axis).
    if d_pad <= 512:
        tn = d_pad
    else:
        tn = 128
        for cand in (512, 384, 256):
            if d_pad % cand == 0:
                tn = cand
                break
    col_tiles = d_pad // tn

    s_pad = pl.cdiv(S, 8) * 8                    # role rows, sublane-aligned

    x_itm = jnp.dtype(x.dtype).itemsize
    out_itm = out_dtype.itemsize
    w_itm = (jnp.dtype(compute_dtype).itemsize if compute_dtype is not None
             else jnp.dtype(w_fe.dtype).itemsize)

    # Sublane granule for the row dimension of the x / out blocks (16 when any
    # of those blocks is sub-32-bit; the in-kernel bf16 cast keeps x f32).
    sub = 16 if min(x_itm, out_itm) < 4 else 8
    unit = sub // math.gcd(S, sub)               # smallest TB with TB*S % sub == 0

    # Row tile TM = TB*S: as large as the VMEM budget allows, aiming at
    # ~target_rows rows, never exceeding the (padded) batch.
    per_row = (2 * F * x_itm                     # x tile (double-buffered)
               + 2 * tn * out_itm                # out tile (double-buffered)
               + tn * 4                          # f32 accumulator temporaries
               + 2 * s_pad * 4)                  # one-hot selector
    fixed = 2 * (F * tn * w_itm + s_pad * tn * 4)   # resident weight + role
    max_tm = max(S * unit, (int(budget * 0.8) - fixed) // per_row)

    tb_vmem = max(unit, ((max_tm // S) // unit) * unit)
    tb_target = max(unit, (max(1, target_rows // S) // unit) * unit)
    tb_data = pl.cdiv(B, unit) * unit
    tb = max(unit, min(tb_vmem, tb_target, tb_data))
    # v7x has 2 TensorCores: ensure the "parallel" row axis has >= 2 steps
    # whenever the batch allows it (harmless on single-TC v5e/v6e).
    while pl.cdiv(B, tb) < 2 and tb > unit:
        tb = max(unit, ((tb // 2) // unit) * unit)

    b_pad = pl.cdiv(B, tb) * tb
    row_tiles = b_pad // tb
    tm = tb * S
    m_pad = b_pad * S

    # ---- host-side prep (tiny, except the optional batch pad of x) -----------
    w_p = w_fe if d_pad == D else jnp.pad(w_fe, ((0, 0), (0, d_pad - D)))
    if compute_dtype is not None:
        w_p = w_p.astype(compute_dtype)

    role_p = (role_emb.reshape(S, D).astype(jnp.float32)
              + b_fe.astype(jnp.float32)[None, :])                 # fold bias
    role_p = jnp.pad(role_p, ((0, s_pad - S), (0, d_pad - D)))

    # One-hot position selector: sel[r, p] = 1 iff row r of a tile holds
    # sequence position p (identical for every row tile since TM % S == 0).
    sel = (np.arange(tm)[:, None] % S == np.arange(s_pad)[None, :]).astype(np.float32)
    sel = jnp.asarray(sel)

    x2 = x.reshape(B * S, F)
    if b_pad != B:
        x2 = jnp.pad(x2, ((0, (b_pad - B) * S), (0, 0)))

    # ---- pallas call ----------------------------------------------------------
    work = per_row * tm + fixed
    vmem_limit = int(min(budget, max(8 << 20, int(work * 1.5))))

    cost = pl.CostEstimate(
        flops=2 * m_pad * d_pad * (F + s_pad),
        transcendentals=0,
        bytes_accessed=(x2.size * x_itm + w_p.size * w_itm
                        + role_p.size * 4 + sel.size * 4
                        + m_pad * d_pad * out_itm))

    kernel = functools.partial(_embed_kernel, compute_dtype=compute_dtype)

    out = pl.pallas_call(
        kernel,
        out_shape=jax.ShapeDtypeStruct((m_pad, d_pad), out_dtype),
        grid_spec=pltpu.PrefetchScalarGridSpec(
            num_scalar_prefetch=0,
            grid=(row_tiles, col_tiles),
            in_specs=[
                pl.BlockSpec((tm, F), lambda i, j: (i, 0)),      # x rows
                pl.BlockSpec((F, tn), lambda i, j: (0, j)),      # weight
                pl.BlockSpec((tm, s_pad), lambda i, j: (0, 0)),  # one-hot selector
                pl.BlockSpec((s_pad, tn), lambda i, j: (0, j)),  # role + bias
            ],
            out_specs=pl.BlockSpec((tm, tn), lambda i, j: (i, j)),
        ),
        compiler_params=pltpu.CompilerParams(
            dimension_semantics=("parallel", "parallel"),
            vmem_limit_bytes=vmem_limit),
        cost_estimate=cost,
    )(x2, w_p, sel, role_p)

    out = out.reshape(b_pad, S, d_pad)
    if return_padded:
        return out
    if b_pad != B or d_pad != D:
        out = out[:B, :, :D]                     # only de-pad when actually padded
    return out


def _xavier_uniform(key, shape, fan_in, fan_out, dtype=jnp.float32):
    limit = (6.0 / (fan_in + fan_out)) ** 0.5
    return jax.random.uniform(key, shape, dtype=dtype, minval=-limit, maxval=limit)


if __name__ == "__main__":
    key = jax.random.PRNGKey(0)
    k1, k2, k3, k4, k5, k6, k7 = jax.random.split(key, 7)

    # ---- Test 1: module-like small shapes, f32 path (exact) ------------------
    B, S, F, D = 2, 6, 8, 32
    w_fe = _xavier_uniform(k1, (F, D), F, D)          # Linear weight (transposed)
    b_fe = jnp.zeros((D,), jnp.float32)               # zeros_ init, as in module
    role = _xavier_uniform(k2, (1, S, D), S * D, D)   # role_embeddings
    x = jax.random.normal(k3, (B, S, F), jnp.float32)

    ref = (jnp.einsum("bsf,fd->bsd", x, w_fe, precision="highest")
           + b_fe[None, None, :] + role)
    out = jax.block_until_ready(alloy_transformer_forward(x, w_fe, b_fe, role))
    assert out.shape == (B, S, D)
    assert jnp.allclose(out, ref, atol=2e-4, rtol=2e-4), \
        float(jnp.max(jnp.abs(out - ref)))

    # ---- Test 2: lane-aligned D (no de-pad), multi-step grid, bf16 compute ---
    B2, S2, F2, D2 = 16, 8, 16, 128
    w2 = _xavier_uniform(k4, (F2, D2), F2, D2)
    b2 = 0.1 * jax.random.normal(k5, (D2,), jnp.float32)
    role2 = _xavier_uniform(k6, (1, S2, D2), S2 * D2, D2)
    x2 = jax.random.normal(k7, (B2, S2, F2), jnp.float32)

    ref2 = (jnp.einsum("bsf,fd->bsd", x2, w2, precision="highest")
            + b2[None, None, :] + role2)
    out2 = jax.block_until_ready(
        alloy_transformer_forward(x2, w2, b2, role2, compute_dtype=jnp.bfloat16))
    assert out2.shape == (B2, S2, D2)
    assert jnp.allclose(out2, ref2, atol=5e-2, rtol=5e-2), \
        float(jnp.max(jnp.abs(out2 - ref2)))

    print("KERNEL_OK")
</pallas_src>

<mosaic_0001>
module attributes {stable_mosaic.version = 11 : i64} {
  func.func @_embed_kernel(%arg0: i32, %arg1: i32, %arg2: memref<24x8xf32, #tpu.memory_space<vmem>>, %arg3: memref<8x128xf32, #tpu.memory_space<vmem>>, %arg4: memref<24x8xf32, #tpu.memory_space<vmem>>, %arg5: memref<8x128xf32, #tpu.memory_space<vmem>>, %arg6: memref<24x128xf32, #tpu.memory_space<vmem>>) attributes {dimension_semantics = [#tpu.dimension_semantics<parallel>, #tpu.dimension_semantics<parallel>], iteration_bounds = array<i64: 1, 1>, scalar_prefetch = 0 : i64, scratch_operands = 0 : i64, tpu.core_type = #tpu.core_type<tc>, window_params = [{transform_indices = @transform_0, window_bounds = array<i64: 24, 8>}, {transform_indices = @transform_1, window_bounds = array<i64: 8, 128>}, {pipeline_mode = #tpu.pipeline_mode<synchronous>, transform_indices = @transform_2, window_bounds = array<i64: 24, 8>}, {transform_indices = @transform_3, window_bounds = array<i64: 8, 128>}, {transform_indices = @transform_4, window_bounds = array<i64: 24, 128>}]} {
    %c0 = arith.constant 0 : index
    %c0_0 = arith.constant 0 : index
    %0 = vector.load %arg2[%c0, %c0_0] : memref<24x8xf32, #tpu.memory_space<vmem>>, vector<24x8xf32>
    %c0_1 = arith.constant 0 : index
    %c0_2 = arith.constant 0 : index
    %1 = vector.load %arg3[%c0_1, %c0_2] : memref<8x128xf32, #tpu.memory_space<vmem>>, vector<8x128xf32>
    %cst = arith.constant dense<0.000000e+00> : vector<24x128xf32>
    %2 = tpu.matmul %0, %1, %cst {dimension_numbers = #tpu.dot_dimension_numbers<[1], [0], [0], [1], [0, 0, 1, 1], [], []>} : vector<24x8xf32>, vector<8x128xf32>, vector<24x128xf32> -> vector<24x128xf32>
    %c0_3 = arith.constant 0 : index
    %c0_4 = arith.constant 0 : index
    %3 = vector.load %arg4[%c0_3, %c0_4] : memref<24x8xf32, #tpu.memory_space<vmem>>, vector<24x8xf32>
    %c0_5 = arith.constant 0 : index
    %c0_6 = arith.constant 0 : index
    %4 = vector.load %arg5[%c0_5, %c0_6] : memref<8x128xf32, #tpu.memory_space<vmem>>, vector<8x128xf32>
    %cst_7 = arith.constant dense<0.000000e+00> : vector<24x128xf32>
    %5 = tpu.matmul %3, %4, %cst_7 {dimension_numbers = #tpu.dot_dimension_numbers<[1], [0], [0], [1], [0, 0, 1, 1], [], []>} : vector<24x8xf32>, vector<8x128xf32>, vector<24x128xf32> -> vector<24x128xf32>
    %6 = arith.addf %2, %5 : vector<24x128xf32>
    %c0_8 = arith.constant 0 : index
    %c0_9 = arith.constant 0 : index
    %7 = vector.load %arg6[%c0_8, %c0_9] : memref<24x128xf32, #tpu.memory_space<vmem>>, vector<24x128xf32>
    tpu.vector_store %arg6[%c0_8, %c0_9], %6 {strides = array<i32>} : memref<24x128xf32, #tpu.memory_space<vmem>>, vector<24x128xf32>,
    return
  }
  func.func @transform_0(%arg0: i32, %arg1: i32) -> (i32, i32) {
    %c0_i32 = arith.constant 0 : i32
    %c0_i32_0 = arith.constant 0 : i32
    return %arg0, %c0_i32 : i32, i32
  }
  func.func @transform_1(%arg0: i32, %arg1: i32) -> (i32, i32) {
    %c0_i32 = arith.constant 0 : i32
    %c0_i32_0 = arith.constant 0 : i32
    return %c0_i32, %arg1 : i32, i32
  }
  func.func @transform_2(%arg0: i32, %arg1: i32) -> (i32, i32) {
    %c0_i32 = arith.constant 0 : i32
    %c0_i32_0 = arith.constant 0 : i32
    %c0_i32_1 = arith.constant 0 : i32
    return %c0_i32, %c0_i32_0 : i32, i32
  }
  func.func @transform_3(%arg0: i32, %arg1: i32) -> (i32, i32) {
    %c0_i32 = arith.constant 0 : i32
    %c0_i32_0 = arith.constant 0 : i32
    return %c0_i32, %arg1 : i32, i32
  }
  func.func @transform_4(%arg0: i32, %arg1: i32) -> (i32, i32) {
    %c0_i32 = arith.constant 0 : i32
    return %arg0, %arg1 : i32, i32
  }
}

</mosaic_0001>

<bundles_post_ra>
// kernel: tpu_custom_call.1
= control target key start
LH: loop header
LB: loop body
LE: loop exit
PB: predicated region body
PF: predicated region fallthrough
CT: control target
= control target key end

     0   :  { %v287_v2 = vmov 0.0   ;;  %vm26_vm0 = vcmask 64512   ;;  %vm288_vm1 = vmmov 0   ;;  %s350_s0 = inlined_call_operand.vmem [shape: f32[24,8], index: 0, kind: input, shape index: {}]   ;;  %s351_s1 = inlined_call_operand.vmem [shape: f32[8,128], index: 1, kind: input, shape index: {}]   ;;  %s352_s2 = inlined_call_operand.vmem [shape: f32[24,8], index: 2, kind: input, shape index: {}]   ;;  %s353_s3 = inlined_call_operand.vmem [shape: f32[8,128], index: 3, kind: input, shape index: {}]   ;;  %s354_s4 = inlined_call_operand.hbm [shape: f32[24,128], index: 4, kind: output, shape index: {}]  }
   0x1   :  { %v25_v0 = vld [vmem:[%s353_s3] sm:$0xff]  ;;  %238 = vmatprep.subr.mxu0 %v287_v2  ;;  %249 = vmatprep.subr.mxu1 %v287_v2 }
   0x2   :  { %v21_v1 = vld [vmem:[%s351_s1] sm:$0xff]  ;;  %239 = vmatpush3.msra.mxu0 %v25_v0  ;;  %240 = vmatprep.mubr.msk.f32.mxu0 %vm288_vm1, %v287_v2 }
   0x3   :  { %v22_v3 = vld [vmem:[%s352_s2] sm:$0xff] }
   0x4   :  { %v18_v4 = vld [vmem:[%s350_s0] sm:$0xff] }
   0x5   :  { %9 = vsyncpa [#allocation3], 0  ;;  %250 = vmatpush3.msra.mxu1 %v21_v1  ;;  %251 = vmatprep.mubr.msk.f32.mxu1 %vm288_vm1, %v287_v2  ;;  %v23_v5 = vld [vmem:[%s352_s2 + $0x8] sm:$0xff]  ;;  %v24_v7 = vld [vmem:[%s352_s2 + $0x10] sm:$0xff]  ;;  %s289_s29 = smov [#allocation2]  }
   0x6   :  { %241 = vmatmul.mubr.msk.f32.vlgmr.msra.gmra.mxu0 %vm26_vm0, %v22_v3  ;;  %252 = vmatmul.mubr.msk.f32.vlgmr.msra.gmra.mxu1 %vm26_vm0, %v18_v4  ;;  %v19_v6 = vld [vmem:[%s350_s0 + $0x8] sm:$0xff]  ;;  %v20_v8 = vld [vmem:[%s350_s0 + $0x10] sm:$0xff]  ;;  %s213_s30 = sshll.u32 %s289_s29, 4  ;;  %s214_s30 = int_to_ptr.vmem [resolvable:$true] %s213_s30 }
   0x7   :  { %243 = vmatprep.mubr.msk.f32.mxu0 %vm288_vm1, %v287_v2  ;;  %254 = vmatprep.mubr.msk.f32.mxu1 %vm288_vm1, %v287_v2  ;;  %s265_s0 = scalar_lea.vmem %s214_s30, 384  ;;  %p270_p1 = scmp.lt.s32.totalorder %s214_s30, %s214_s30 }
   0x8   :  { %p266_p0 = scmp.ne.s32.totalorder %s214_s30, %s265_s0  ;;  %p271_p2 = scmp.lt.s32.totalorder %s265_s0, %s265_s0 }
   0xa   :  { %244 = vmatmul.mubr.msk.f32.gmra.mxu0 %vm26_vm0, %v23_v5  ;;  %255 = vmatmul.mubr.msk.f32.gmra.mxu1 %vm26_vm0, %v19_v6  ;;  %p272_p3 = por %p271_p2, %p270_p1 }
   0xb   :  { %246 = vmatprep.mubr.msk.f32.mxu0 %vm288_vm1, %v287_v2  ;;  %257 = vmatprep.mubr.msk.f32.mxu1 %vm288_vm1, %v287_v2 }
   0xc   :  { %p273_p4 = pnand %p272_p3, %p266_p0 }
   0xe   :  { %247 = vmatmul.mubr.msk.f32.gmra.mxu0 %vm26_vm0, %v24_v7  ;;  %258 = vmatmul.mubr.msk.f32.gmra.mxu1 %vm26_vm0, %v20_v8 }
  0xc6   :  { %v102_v9 = vpop.f32.mrf.mxu0  ;;  %v191_v10 = vpop.f32.mrf.mxu1 }
  0xc7   :  { %v192_v11 = vadd.f32 %v191_v10, %v102_v9 }
  0xc8   :  { %v242_v12 = vpop.f32.mrf.mxu0  ;;  %v253_v13 = vpop.f32.mrf.mxu1 }
  0xc9   :  { %205 = vst [vmem:[#allocation2] sm:$0xff] %v192_v11 }
  0xca   :  { %v107_v14 = vpop.f32.mrf.mxu0  ;;  %v196_v15 = vpop.f32.mrf.mxu1 }
  0xcb   :  { %v197_v16 = vadd.f32 %v196_v15, %v107_v14 }
  0xcc   :  { %v245_v17 = vpop.f32.mrf.mxu0  ;;  %v256_v18 = vpop.f32.mrf.mxu1 }
  0xcd   :  { %206 = vst [vmem:[#allocation2 + $0x8] sm:$0xff] %v197_v16 }
  0xce   :  { %v112_v19 = vpop.f32.mrf.mxu0  ;;  %v201_v20 = vpop.f32.mrf.mxu1 }
  0xcf   :  { %v202_v21 = vadd.f32 %v201_v20, %v112_v19 }
  0xd0   :  { %v248_v22 = vpop.f32.mrf.mxu0  ;;  %v259_v23 = vpop.f32.mrf.mxu1 }
  0xd1   :  { %207 = vst [vmem:[#allocation2 + $0x10] sm:$0xff] %v202_v21 }
  0xd2   :  { %276 = shalt.err (!%p273_p4)
}
  0xd3   :  { %s290_s2 = smov 128   ;;  %s291_s5 = smov 8  }
  0xd4   :  { %219 = dma.vmem_to_hbm [thread:$0]  %s214_s30, 384, %s354_s4, [#allocation3], %s290_s2, %s290_s2, %s291_s5  }
  0xd5   :  { %285 = dma.done.wait [#allocation3], 384  }
  0xd6   :  { %286 = vsyncadd [#allocation3], 4294966912 }
  0xd7   :  { %223 = vsyncpa [#allocation3], 1 }

</bundles_post_ra>
